<compile_context>
chip_gen: v6e
topology: v6e:2x2x1
jax: 0.10.0
libtpu: 0.0.40
codegen_flags: <defaults>
</compile_context>

<pallas_src>
import functools

import jax
import jax.numpy as jnp
from jax import lax
from jax.experimental import pallas as pl
from jax.experimental.pallas import tpu as pltpu


def _round_up(x, m):
    return ((x + m - 1) // m) * m


# ----------------------------------------------------------------------------
# Kernel 1 (fused): cross-entropy-loss sum + first-argmax correct count.
#   logits_ref : (Cp, T)  native dtype  -- classes on sublanes, rows on lanes
#   labels_ref : (1,  T)  int32         -- lane-aligned with the logits rows
#   loss_ref   : (1, 1, 1) f32 per-split accumulator (sum of lse - picked)
#   acc_ref    : (1, 1, 1) f32 per-split accumulator (count of correct rows)
# ----------------------------------------------------------------------------
def _fused_ce_acc_kernel(logits_ref, labels_ref, loss_ref, acc_ref):
    inner = pl.program_id(1)

    @pl.when(inner == 0)
    def _init():
        loss_ref[...] = jnp.zeros_like(loss_ref)
        acc_ref[...] = jnp.zeros_like(acc_ref)

    x = logits_ref[...]                                   # (Cp, T) native dtype
    labels = labels_ref[...]                              # (1, T) int32
    cp, t = x.shape
    cls = lax.broadcasted_iota(jnp.int32, (cp, t), 0)     # class id per sublane

    # Row statistics: sublane reduces over the (padded) class axis.
    m = jnp.max(x, axis=0, keepdims=True)                 # (1, T) native dtype
    # bf16 stays bf16 through the subtract; f32 only from exp onwards.
    e = jnp.exp((x - m).astype(jnp.float32))              # (Cp, T) f32
    lse = jnp.log(jnp.sum(e, axis=0, keepdims=True)) + m.astype(jnp.float32)

    # Picked logit x[row, label[row]]: one-hot select, exact (single nonzero).
    onehot = cls == labels                                 # (Cp, T) bool
    picked = jnp.sum(jnp.where(onehot, x, 0).astype(jnp.float32),
                     axis=0, keepdims=True)                # (1, T)

    # First index attaining the max (matches torch / jnp argmax tie-breaking).
    amax = jnp.min(jnp.where(x == m, cls, cp), axis=0, keepdims=True)  # (1, T)
    correct = (amax == labels).astype(jnp.float32)         # (1, T)

    # Padded rows were built as [0, sentinel, ...] with label -1:
    # lse == 0, picked == 0, amax == 0 != -1  -> exactly zero contribution.
    loss_tile = jnp.sum(lse - picked, axis=1, keepdims=True)   # (1, 1)
    acc_tile = jnp.sum(correct, axis=1, keepdims=True)         # (1, 1)
    loss_ref[0] += loss_tile
    acc_ref[0] += acc_tile
    # Final 1/B scaling and the cross-split sum happen in the wrapper.


def pallas_cross_entropy_and_accuracy(logits, labels, *, tile_lanes=None,
                                      use_fast_path=True):
    """logits: (..., C) float (native dtype); labels: (...) int.
    Returns (mean CE loss, accuracy of argmax(logits) vs labels)."""
    num_cls = logits.shape[-1]
    flat_logits = logits.reshape(-1, num_cls)
    flat_labels = labels.reshape(-1).astype(jnp.int32)
    batch = flat_logits.shape[0]

    # Fast path: typical episodic batches (B = N*Q) are tiny; pallas_call
    # dispatch + DMA setup dwarfs <1us of compute, so use plain jnp.
    if use_fast_path and batch * num_cls <= 64 * 1024:
        x = flat_logits.astype(jnp.float32)
        m = jnp.max(x, axis=-1, keepdims=True)
        lse = jnp.log(jnp.sum(jnp.exp(x - m), axis=-1, keepdims=True)) + m
        picked = jnp.take_along_axis(x, flat_labels[:, None], axis=-1)
        loss = jnp.mean(lse - picked)
        pred = jnp.argmax(x, axis=-1).astype(jnp.int32)
        acc = jnp.mean((pred == flat_labels).astype(jnp.float32))
        return loss, acc

    cp = max(8, _round_up(num_cls, 8))          # class dim padded to sublanes
    n_splits = 2 if batch >= 256 else 1         # leading "parallel" axis (v7x 2 TCs)

    # ~2 MiB (f32-equivalent) logits block per grid step: amortizes the
    # ~0.35us/step overhead while staying well inside a 32 MiB scoped VMEM
    # budget (double-buffered inputs + f32 temporaries) on v5e/v6e/v7x.
    if tile_lanes is None:
        t_lane = (2 * 1024 * 1024) // (cp * 4)
    else:
        t_lane = int(tile_lanes)
    t_lane = max(128, (t_lane // 128) * 128)
    per_split = _round_up(-(-batch // n_splits), 128)
    t_lane = min(t_lane, per_split)
    tiles_per_split = -(-per_split // t_lane)
    b_pad = n_splits * tiles_per_split * t_lane
    pad_rows = b_pad - batch

    # Sentinel: most-negative finite value of the logits dtype.
    # exp(sentinel - m) == 0 and it never attains the row max.
    # (TODO(synk): for fp16/fp8 logits with extreme ranges this sentinel is
    #  weaker; bf16/f32 -- the realistic dtypes here -- are fine.)
    sentinel = float(jnp.finfo(flat_logits.dtype).min)

    # Dense layout: (Cp, B) -- classes on sublanes, batch lane-dense. The
    # natural (B, C) HBM layout would be minor-dim padded to 128 (~25x bytes).
    x_t = jnp.pad(flat_logits.T, ((0, cp - num_cls), (0, pad_rows)),
                  constant_values=sentinel)
    if pad_rows:
        # Padded rows: [0, sentinel, ...] with label -1 -> zero contribution.
        x_t = x_t.at[0, batch:].set(jnp.zeros((), dtype=x_t.dtype))
        flat_labels = jnp.pad(flat_labels, (0, pad_rows), constant_values=-1)
    labels2d = flat_labels.reshape(1, b_pad)

    loss_parts, acc_parts = pl.pallas_call(
        _fused_ce_acc_kernel,
        out_shape=(jax.ShapeDtypeStruct((n_splits, 1, 1), jnp.float32),
                   jax.ShapeDtypeStruct((n_splits, 1, 1), jnp.float32)),
        grid=(n_splits, tiles_per_split),
        in_specs=[
            pl.BlockSpec((cp, t_lane), lambda c, i: (0, c * tiles_per_split + i)),
            pl.BlockSpec((1, t_lane), lambda c, i: (0, c * tiles_per_split + i)),
        ],
        out_specs=(
            pl.BlockSpec((1, 1, 1), lambda c, i: (c, 0, 0)),   # per-split accum
            pl.BlockSpec((1, 1, 1), lambda c, i: (c, 0, 0)),
        ),
        compiler_params=pltpu.CompilerParams(
            dimension_semantics=("parallel", "arbitrary"),
            vmem_limit_bytes=32 * 1024 * 1024,
        ),
    )(x_t, labels2d)

    inv_batch = 1.0 / batch
    return jnp.sum(loss_parts) * inv_batch, jnp.sum(acc_parts) * inv_batch


# ----------------------------------------------------------------------------
# Kernel 2 (API parity): accuracy(pred, label) with a lane-dense layout.
# ----------------------------------------------------------------------------
_ACC_LANES = 128


def _accuracy_kernel(pred_ref, label_ref, acc_ref, *, inv_count):
    step = pl.program_id(0)

    @pl.when(step == 0)
    def _init():
        acc_ref[...] = jnp.zeros_like(acc_ref)

    eq = (pred_ref[...] == label_ref[...]).astype(jnp.float32)   # (TILE_R, 128)
    acc_ref[...] += jnp.sum(eq, axis=(0, 1), keepdims=True)

    @pl.when(step == pl.num_programs(0) - 1)
    def _finalize():
        acc_ref[...] = acc_ref[...] * inv_count


def pallas_accuracy(pred, label, *, tile_rows=2048, use_fast_path=True):
    flat_pred = pred.reshape(-1).astype(jnp.int32)
    flat_label = label.reshape(-1).astype(jnp.int32)
    n = flat_pred.shape[0]

    if use_fast_path and n <= 64 * 1024:
        return jnp.mean((flat_pred == flat_label).astype(jnp.float32))

    rows = -(-n // _ACC_LANES)
    tile_rows = max(8, min(int(tile_rows), _round_up(rows, 8)))
    rows_pad = _round_up(rows, tile_rows)
    total = rows_pad * _ACC_LANES

    # Padding values can never compare equal (0 vs -1).
    flat_pred = jnp.pad(flat_pred, (0, total - n), constant_values=0)
    flat_label = jnp.pad(flat_label, (0, total - n), constant_values=-1)
    pred2d = flat_pred.reshape(rows_pad, _ACC_LANES)
    label2d = flat_label.reshape(rows_pad, _ACC_LANES)
    num_tiles = rows_pad // tile_rows

    out = pl.pallas_call(
        functools.partial(_accuracy_kernel, inv_count=1.0 / n),
        out_shape=jax.ShapeDtypeStruct((1, 1), jnp.float32),
        grid=(num_tiles,),
        in_specs=[
            pl.BlockSpec((tile_rows, _ACC_LANES), lambda i: (i, 0)),
            pl.BlockSpec((tile_rows, _ACC_LANES), lambda i: (i, 0)),
        ],
        out_specs=pl.BlockSpec((1, 1), lambda i: (0, 0)),
        compiler_params=pltpu.CompilerParams(
            dimension_semantics=("arbitrary",),
            vmem_limit_bytes=32 * 1024 * 1024,
        ),
    )(pred2d, label2d)
    return out[0, 0]


# ----------------------------------------------------------------------------
# JAX-side shell mirroring FewShotREModel.
# ----------------------------------------------------------------------------
class FewShotREModelPallas:
    def __init__(self, sentence_encoder=None):
        # TODO(synk): nn.DataParallel(sentence_encoder) wrapping has no Pallas
        # equivalent; the encoder stays an external JAX callable.
        self.sentence_encoder = sentence_encoder

    def forward(self, support, query, N, K, Q):
        # TODO(synk): abstract in the reference (raises NotImplementedError).
        raise NotImplementedError

    def loss(self, logits, label):
        loss, _ = pallas_cross_entropy_and_accuracy(logits, label)
        return loss

    def accuracy(self, pred, label):
        return pallas_accuracy(pred, label)

    def loss_and_accuracy(self, logits, label):
        # Fused single-pass hot path (accuracy uses first-argmax of logits).
        return pallas_cross_entropy_and_accuracy(logits, label)


if __name__ == "__main__":
    key = jax.random.PRNGKey(0)
    k1, k2, k3, k4 = jax.random.split(key, 4)

    model = FewShotREModelPallas()

    # --- Test 1: small episodic batch, f32, Pallas path forced --------------
    N, K, Q = 5, 2, 3
    B = N * Q
    logits = jax.random.normal(k1, (B, N), dtype=jnp.float32)
    labels = jax.random.randint(k2, (B,), 0, N, dtype=jnp.int32)

    loss_p, acc_p = pallas_cross_entropy_and_accuracy(logits, labels,
                                                      use_fast_path=False)
    loss_p = jax.block_until_ready(loss_p)
    acc_p = jax.block_until_ready(acc_p)

    logp = jax.nn.log_softmax(logits, axis=-1)
    ref_loss = -jnp.mean(jnp.take_along_axis(logp, labels[:, None], axis=-1)[:, 0])
    pred = jnp.argmax(logits, axis=-1).astype(jnp.int32)
    ref_acc = jnp.mean((pred == labels).astype(jnp.float32))

    assert jnp.allclose(loss_p, ref_loss, atol=1e-5, rtol=1e-5), (loss_p, ref_loss)
    assert jnp.allclose(acc_p, ref_acc, atol=1e-6), (acc_p, ref_acc)

    # Fast (non-Pallas) path used for tiny batches must agree.
    loss_f, acc_f = model.loss_and_accuracy(logits, labels)
    assert jnp.allclose(loss_f, ref_loss, atol=1e-5, rtol=1e-5), (loss_f, ref_loss)
    assert jnp.allclose(acc_f, ref_acc, atol=1e-6), (acc_f, ref_acc)

    # Standalone accuracy kernel (Pallas path forced).
    acc_k = jax.block_until_ready(pallas_accuracy(pred, labels, use_fast_path=False))
    assert jnp.allclose(acc_k, ref_acc, atol=1e-6), (acc_k, ref_acc)

    # --- Test 2: multi-tile grid + 2-way split + bf16 late upcast ------------
    B2, C2 = 700, 7
    logits2 = jax.random.normal(k3, (B2, C2), dtype=jnp.float32).astype(jnp.bfloat16)
    labels2 = jax.random.randint(k4, (B2,), 0, C2, dtype=jnp.int32)
    loss2, acc2 = pallas_cross_entropy_and_accuracy(
        logits2, labels2, tile_lanes=128, use_fast_path=False)
    loss2 = jax.block_until_ready(loss2)
    acc2 = jax.block_until_ready(acc2)

    l2f = logits2.astype(jnp.float32)
    logp2 = jax.nn.log_softmax(l2f, axis=-1)
    ref_loss2 = -jnp.mean(jnp.take_along_axis(logp2, labels2[:, None], axis=-1)[:, 0])
    ref_acc2 = jnp.mean(
        (jnp.argmax(l2f, axis=-1).astype(jnp.int32) == labels2).astype(jnp.float32))
    # The kernel keeps bf16 through max/subtract (f32 only from exp onwards),
    # so allow bf16-level tolerance on the loss; argmax/accuracy is exact.
    assert jnp.allclose(loss2, ref_loss2, atol=2e-2, rtol=1e-2), (loss2, ref_loss2)
    assert jnp.allclose(acc2, ref_acc2, atol=1e-6), (acc2, ref_acc2)

    print("KERNEL_OK")
</pallas_src>

<mosaic_0001>
module attributes {stable_mosaic.version = 11 : i64} {
  func.func @_fused_ce_acc_kernel(%arg0: i32, %arg1: i32, %arg2: memref<8x128xf32, #tpu.memory_space<vmem>>, %arg3: memref<1x128xi32, #tpu.memory_space<vmem>>, %arg4: memref<1x1x1xf32, #tpu.memory_space<vmem>>, %arg5: memref<1x1x1xf32, #tpu.memory_space<vmem>>) attributes {dimension_semantics = [#tpu.dimension_semantics<parallel>, #tpu.dimension_semantics<arbitrary>], iteration_bounds = array<i64: 1, 1>, scalar_prefetch = 0 : i64, scratch_operands = 0 : i64, tpu.core_type = #tpu.core_type<tc>, window_params = [{transform_indices = @transform_0, window_bounds = array<i64: 8, 128>}, {transform_indices = @transform_1, window_bounds = array<i64: 1, 128>}, {transform_indices = @transform_2, window_bounds = array<i64: 1, 1, 1>}, {transform_indices = @transform_3, window_bounds = array<i64: 1, 1, 1>}]} {
    %c0_i32 = arith.constant 0 : i32
    %0 = arith.cmpi eq, %arg1, %c0_i32 : i32
    %1 = arith.extui %0 : i1 to i32
    %c0_i32_0 = arith.constant 0 : i32
    %2 = arith.cmpi ne, %1, %c0_i32_0 : i32
    scf.if %2 {
      %cst_22 = arith.constant 0.000000e+00 : f32
      %48 = vector.broadcast %cst_22 : f32 to vector<1x1x1xf32>
      %c0_23 = arith.constant 0 : index
      %c0_24 = arith.constant 0 : index
      %c0_25 = arith.constant 0 : index
      %49 = vector.load %arg4[%c0_23, %c0_24, %c0_25] : memref<1x1x1xf32, #tpu.memory_space<vmem>>, vector<1x1x1xf32>
      tpu.vector_store %arg4[%c0_23, %c0_24, %c0_25], %48 {strides = array<i32>} : memref<1x1x1xf32, #tpu.memory_space<vmem>>, vector<1x1x1xf32>,
      %cst_26 = arith.constant 0.000000e+00 : f32
      %50 = vector.broadcast %cst_26 : f32 to vector<1x1x1xf32>
      %c0_27 = arith.constant 0 : index
      %c0_28 = arith.constant 0 : index
      %c0_29 = arith.constant 0 : index
      %51 = vector.load %arg5[%c0_27, %c0_28, %c0_29] : memref<1x1x1xf32, #tpu.memory_space<vmem>>, vector<1x1x1xf32>
      tpu.vector_store %arg5[%c0_27, %c0_28, %c0_29], %50 {strides = array<i32>} : memref<1x1x1xf32, #tpu.memory_space<vmem>>, vector<1x1x1xf32>,
    } else {
    }
    %c0 = arith.constant 0 : index
    %c0_1 = arith.constant 0 : index
    %3 = vector.load %arg2[%c0, %c0_1] : memref<8x128xf32, #tpu.memory_space<vmem>>, vector<8x128xf32>
    %c0_2 = arith.constant 0 : index
    %c0_3 = arith.constant 0 : index
    %4 = vector.load %arg3[%c0_2, %c0_3] : memref<1x128xi32, #tpu.memory_space<vmem>>, vector<1x128xi32>
    %5 = tpu.iota {dimensions = array<i32: 0>} : vector<8x128xi32>
    %cst = arith.constant dense<0xFF800000> : vector<128xf32>
    %6 = vector.multi_reduction <maximumf>, %3, %cst [0] : vector<8x128xf32> to vector<128xf32>
    %7 = vector.shape_cast %6 : vector<128xf32> to vector<1x128xf32>
    %8 = vector.broadcast %7 : vector<1x128xf32> to vector<8x128xf32>
    %9 = arith.subf %3, %8 : vector<8x128xf32>
    %10 = math.exp %9 : vector<8x128xf32>
    %cst_4 = arith.constant dense<0.000000e+00> : vector<128xf32>
    %11 = vector.multi_reduction <add>, %10, %cst_4 [0] : vector<8x128xf32> to vector<128xf32>
    %12 = vector.shape_cast %11 : vector<128xf32> to vector<1x128xf32>
    %13 = math.log %12 : vector<1x128xf32>
    %14 = arith.addf %13, %7 : vector<1x128xf32>
    %15 = vector.broadcast %4 : vector<1x128xi32> to vector<8x128xi32>
    %16 = arith.cmpi eq, %5, %15 : vector<8x128xi32>
    %c0_i32_5 = arith.constant 0 : i32
    %17 = arith.sitofp %c0_i32_5 : i32 to f32
    %18 = vector.broadcast %17 : f32 to vector<8x128xf32>
    %19 = arith.select %16, %3, %18 : vector<8x128xi1>, vector<8x128xf32>
    %cst_6 = arith.constant dense<0.000000e+00> : vector<128xf32>
    %20 = vector.multi_reduction <add>, %19, %cst_6 [0] : vector<8x128xf32> to vector<128xf32>
    %21 = vector.shape_cast %20 : vector<128xf32> to vector<1x128xf32>
    %22 = vector.broadcast %7 : vector<1x128xf32> to vector<8x128xf32>
    %23 = arith.cmpf oeq, %3, %22 : vector<8x128xf32>
    %c8_i32 = arith.constant 8 : i32
    %24 = vector.broadcast %c8_i32 : i32 to vector<8x128xi32>
    %25 = arith.select %23, %5, %24 : vector<8x128xi1>, vector<8x128xi32>
    %cst_7 = arith.constant dense<2147483647> : vector<128xi32>
    %26 = vector.multi_reduction <minsi>, %25, %cst_7 [0] : vector<8x128xi32> to vector<128xi32>
    %27 = vector.shape_cast %26 : vector<128xi32> to vector<1x128xi32>
    %28 = arith.cmpi eq, %27, %4 : vector<1x128xi32>
    %29 = arith.extui %28 : vector<1x128xi1> to vector<1x128xi32>
    %30 = arith.sitofp %29 : vector<1x128xi32> to vector<1x128xf32>
    %31 = arith.subf %14, %21 : vector<1x128xf32>
    %cst_8 = arith.constant dense<0.000000e+00> : vector<1xf32>
    %32 = vector.multi_reduction <add>, %31, %cst_8 [1] : vector<1x128xf32> to vector<1xf32>
    %33 = vector.shape_cast %32 : vector<1xf32> to vector<1x1xf32>
    %cst_9 = arith.constant dense<0.000000e+00> : vector<1xf32>
    %34 = vector.multi_reduction <add>, %30, %cst_9 [1] : vector<1x128xf32> to vector<1xf32>
    %35 = vector.shape_cast %34 : vector<1xf32> to vector<1x1xf32>
    %c0_10 = arith.constant 0 : index
    %c0_11 = arith.constant 0 : index
    %c0_12 = arith.constant 0 : index
    %36 = vector.load %arg4[%c0_10, %c0_11, %c0_12] : memref<1x1x1xf32, #tpu.memory_space<vmem>>, vector<1x1x1xf32>
    %37 = vector.shape_cast %36 : vector<1x1x1xf32> to vector<1x1xf32>
    %38 = arith.addf %37, %33 : vector<1x1xf32>
    %c0_13 = arith.constant 0 : index
    %c0_14 = arith.constant 0 : index
    %c0_15 = arith.constant 0 : index
    %39 = vector.load %arg4[%c0_13, %c0_14, %c0_15] : memref<1x1x1xf32, #tpu.memory_space<vmem>>, vector<1x1x1xf32>
    %40 = vector.shape_cast %39 : vector<1x1x1xf32> to vector<1x1xf32>
    %41 = vector.shape_cast %38 : vector<1x1xf32> to vector<1x1x1xf32>
    tpu.vector_store %arg4[%c0_13, %c0_14, %c0_15], %41 {strides = array<i32>} : memref<1x1x1xf32, #tpu.memory_space<vmem>>, vector<1x1x1xf32>,
    %c0_16 = arith.constant 0 : index
    %c0_17 = arith.constant 0 : index
    %c0_18 = arith.constant 0 : index
    %42 = vector.load %arg5[%c0_16, %c0_17, %c0_18] : memref<1x1x1xf32, #tpu.memory_space<vmem>>, vector<1x1x1xf32>
    %43 = vector.shape_cast %42 : vector<1x1x1xf32> to vector<1x1xf32>
    %44 = arith.addf %43, %35 : vector<1x1xf32>
    %c0_19 = arith.constant 0 : index
    %c0_20 = arith.constant 0 : index
    %c0_21 = arith.constant 0 : index
    %45 = vector.load %arg5[%c0_19, %c0_20, %c0_21] : memref<1x1x1xf32, #tpu.memory_space<vmem>>, vector<1x1x1xf32>
    %46 = vector.shape_cast %45 : vector<1x1x1xf32> to vector<1x1xf32>
    %47 = vector.shape_cast %44 : vector<1x1xf32> to vector<1x1x1xf32>
    tpu.vector_store %arg5[%c0_19, %c0_20, %c0_21], %47 {strides = array<i32>} : memref<1x1x1xf32, #tpu.memory_space<vmem>>, vector<1x1x1xf32>,
    return
  }
  func.func @transform_0(%arg0: i32, %arg1: i32) -> (i32, i32) {
    %c1_i32 = arith.constant 1 : i32
    %0 = arith.muli %arg0, %c1_i32 : i32
    %1 = arith.addi %0, %arg1 : i32
    %c0_i32 = arith.constant 0 : i32
    %c0_i32_0 = arith.constant 0 : i32
    return %c0_i32, %1 : i32, i32
  }
  func.func @transform_1(%arg0: i32, %arg1: i32) -> (i32, i32) {
    %c1_i32 = arith.constant 1 : i32
    %0 = arith.muli %arg0, %c1_i32 : i32
    %1 = arith.addi %0, %arg1 : i32
    %c0_i32 = arith.constant 0 : i32
    %c0_i32_0 = arith.constant 0 : i32
    return %c0_i32, %1 : i32, i32
  }
  func.func @transform_2(%arg0: i32, %arg1: i32) -> (i32, i32, i32) {
    %c0_i32 = arith.constant 0 : i32
    %c0_i32_0 = arith.constant 0 : i32
    %c0_i32_1 = arith.constant 0 : i32
    return %arg0, %c0_i32, %c0_i32_0 : i32, i32, i32
  }
  func.func @transform_3(%arg0: i32, %arg1: i32) -> (i32, i32, i32) {
    %c0_i32 = arith.constant 0 : i32
    %c0_i32_0 = arith.constant 0 : i32
    %c0_i32_1 = arith.constant 0 : i32
    return %arg0, %c0_i32, %c0_i32_0 : i32, i32, i32
  }
}

</mosaic_0001>

<bundles_post_ra>
// kernel: tpu_custom_call.1
= control target key start
LH: loop header
LB: loop body
LE: loop exit
PB: predicated region body
PF: predicated region fallthrough
CT: control target
= control target key end

     0   :  { %9 = vsyncpa [#allocation3], 0  ;;  %s261_s0 = inlined_call_operand.hbm [shape: f32[8,128], index: 0, kind: input, shape index: {}]   ;;  %s262_s1 = inlined_call_operand.vmem [shape: s32[1,128], index: 1, kind: input, shape index: {}]   ;;  %s263_s2 = inlined_call_operand.hbm [shape: f32[1,1,1], index: 2, kind: output, shape index: {0}]   ;;  %s264_s3 = inlined_call_operand.hbm [shape: f32[1,1,1], index: 3, kind: output, shape index: {1}]  }
   0x1   :  { %10 = vsyncpa [#allocation4], 0 }
   0x2   :  { %11 = vsyncpa [#allocation7], 0  ;;  %s221_s12 = smov [#allocation2]  }
   0x3   :  { %s21_s13 = sshll.u32 %s221_s12, 4  ;;  %s22_s13 = int_to_ptr.vmem [resolvable:$true] %s21_s13 }
   0x4   :  { %s163_s14 = scalar_lea.vmem %s22_s13, 128  ;;  %p168_p1 = scmp.lt.s32.totalorder %s22_s13, %s22_s13 }
   0x5   :  { %p164_p0 = scmp.ne.s32.totalorder %s22_s13, %s163_s14  ;;  %p169_p2 = scmp.lt.s32.totalorder %s163_s14, %s163_s14 }
   0x7   :  { %p170_p3 = por %p169_p2, %p168_p1 }
   0x9   :  { %p171_p4 = pnand %p170_p3, %p164_p0 }
   0xb   :  { %174 = shalt.err (!%p171_p4)
}
   0xc   :  { %24 = dma.hbm_to_vmem [thread:$0]  %s261_s0, 128, %s22_s13, [#allocation3]  }
   0xd   :  { %215 = dma.done.wait [#allocation3], 128  }
   0xe   :  { %216 = vsyncadd [#allocation3], 4294967168  ;;  %vm49_vm0 = vcmask 0   ;;  %v222_v0 = vmov 0.0   ;;  %v52_v1 = vld [vmem:[#allocation2] sm:$0xff]  ;;  %v54_v9 = vlaneseq  ;;  %vm103_vm7 = vcmask 1040384  }
   0xf   :  { %50 = vst.msk [vmem:[#allocation5] sm:$0x1] %vm49_vm0, %v222_v0  ;;  %51 = vst.msk [vmem:[#allocation6] sm:$0x1] %vm49_vm0, %v222_v0  ;;  %v56_v2 = vrot.slane %v52_v1, 4  ;;  %s224_s19 = smov [#allocation6]  }
  0x10   :  { %v55_v11 = vshrl.u32 %v54_v9, 7  ;;  %v53_v13 = vld [vmem:[%s262_s1] sm:$0x1]  ;;  %s223_s1 = smov [#allocation5]   ;;  %s130_s20 = sshll.u32 %s224_s19, 4  ;;  %s131_s20 = int_to_ptr.vmem [resolvable:$true] %s130_s20 }
  0x11   :  { %v57_v3 = vmax.f32 %v52_v1, %v56_v2  ;;  %s120_s18 = sshll.u32 %s223_s1, 4  ;;  %s121_s18 = int_to_ptr.vmem [resolvable:$true] %s120_s18 }
  0x12   :  { %v76_v12 = vsub.s32 0, %v55_v11  ;;  %s175_s21 = scalar_lea.vmem %s121_s18, 16  ;;  %s179_s22 = scalar_lea.vmem %s121_s18, 32 }
  0x13   :  { %v58_v4 = vrot.slane %v57_v3, 2  ;;  %p176_p5 = scmp.ne.s32.totalorder %s121_s18, %s175_s21  ;;  %p180_p6 = scmp.lt.s32.totalorder %s121_s18, %s121_s18 }
  0x14   :  { %v77_v15 = vrot.slane %v53_v13, %v76_v12  ;;  %p181_p7 = scmp.lt.s32.totalorder %s179_s22, %s175_s21 }
  0x15   :  { %v59_v5 = vmax.f32 %v57_v3, %v58_v4 }
  0x16   :  { %vm78_vm2 = vcmp.eq.s32.totalorder %v55_v11, %v77_v15  ;;  %v107_v42 = vld [vmem:[#allocation5] sm:$0x1]  ;;  %v111_v45 = vld [vmem:[#allocation6] sm:$0x1]  ;;  %p182_p8 = por %p181_p7, %p180_p6 }
  0x17   :  { %v60_v6 = vrot.slane %v59_v5, 1  ;;  %v79_v20 = vsel %vm78_vm2, %v52_v1, 0.0 }
  0x18   :  { %v80_v24 = vrot.slane %v79_v20, 4  ;;  %p183_p9 = pnand %p182_p8, %p176_p5 }
  0x19   :  { %v61_v7 = vmax.f32 %v59_v5, %v60_v6 }
  0x1a   :  { %v81_v28 = vadd.f32 %v80_v24, %v79_v20 }
  0x1b   :  { %v62_v8 = vsub.f32 %v52_v1, %v61_v7  ;;  %vm86_vm1 = vcmp.eq.f32.partialorder %v52_v1, %v61_v7 }
  0x1c   :  { %v87_v14 = vsel %vm86_vm1, %v55_v11, 8  ;;  %v82_v29 = vrot.slane %v81_v28, 2 }
  0x1d   :  { %v63_v10 = vmul.f32 1.442695, %v62_v8  ;;  %v88_v16 = vrot.slane %v87_v14, 4 }
  0x1e   :  { %v83_v32 = vadd.f32 %v82_v29, %v81_v28 }
  0x1f   :  { %151 = vpow2.f32 %v63_v10  ;;  %vm89_vm3 = vcmp.lt.s32.totalorder %v87_v14, %v88_v16 }
  0x20   :  { %v90_v22 = vsel %vm89_vm3, %v87_v14, %v88_v16  ;;  %v84_v33 = vrot.slane %v83_v32, 1 }
  0x21   :  { %v91_v25 = vrot.slane %v90_v22, 2 }
  0x22   :  { %v85_v37 = vadd.f32 %v84_v33, %v83_v32 }
  0x23   :  { %vm92_vm4 = vcmp.lt.s32.totalorder %v90_v22, %v91_v25 }
  0x24   :  { %v93_v30 = vsel %vm92_vm4, %v90_v22, %v91_v25 }
  0x25   :  { %v94_v31 = vrot.slane %v93_v30, 1 }
  0x27   :  { %vm95_vm5 = vcmp.lt.s32.totalorder %v93_v30, %v94_v31 }
  0x28   :  { %v96_v34 = vsel %vm95_vm5, %v93_v30, %v94_v31 }
  0x29   :  { %vm97_vm6 = vcmp.eq.s32.totalorder %v96_v34, %v53_v13 }
  0x2a   :  { %v146_v40 = vsel %vm97_vm6, 1.0, %v222_v0 }
  0x2b   :  { %v104_v41 = vsel %vm103_vm7, %v146_v40, 0.0 }
  0x2c   :  { %v152_v17 = vpop.eup %151 }
  0x2d   :  { %v65_v18 = vrot.slane %v152_v17, 4 }
  0x2f   :  { %v66_v19 = vadd.f32 %v152_v17, %v65_v18 }
  0x31   :  { %v67_v21 = vrot.slane %v66_v19, 2 }
  0x33   :  { %v68_v23 = vadd.f32 %v67_v21, %v66_v19 }
  0x35   :  { %v69_v26 = vrot.slane %v68_v23, 1 }
  0x37   :  { %v70_v27 = vadd.f32 %v69_v26, %v68_v23 }
  0x39   :  { %153 = vlog2.f32 %v70_v27 }
  0x46   :  { %v154_v35 = vpop.eup %153 }
  0x47   :  { %v72_v36 = vmul.f32 0.6931472, %v154_v35 }
  0x49   :  { %v73_v38 = vadd.f32 %v72_v36, %v61_v7 }
  0x4b   :  { %v100_v39 = vsub.f32 %v73_v38, %v85_v37 }
  0x4d   :  { %101 = vadd.xlane.f32.xlu0 %v100_v39 }
  0x51   :  { %105 = vadd.xlane.f32.xlu0 %v104_v41 }
  0xd6   :  { %v102_v43 = vpop.xlane.xlu0 %101 }
  0xd7   :  { %v108_v44 = vadd.f32 %v107_v42, %v102_v43 }
  0xd9   :  { %110 = vst.msk [vmem:[#allocation5] sm:$0x1] %vm49_vm0, %v108_v44 }
  0xda   :  { %v106_v46 = vpop.xlane.xlu0 %105 }
  0xdb   :  { %186 = shalt.err (!%p183_p9)
}
  0xdc   :  { %123 = dma.vmem_to_hbm [thread:$0]  %s121_s18, 16, %s263_s2, [#allocation4]   ;;  %v112_v47 = vadd.f32 %v111_v45, %v106_v46 }
  0xdd   :  { %s195_s25 = scalar_lea.vmem %s131_s20, 16  ;;  %s199_s26 = scalar_lea.vmem %s131_s20, 32 }
  0xde   :  { %113 = vst.msk [vmem:[#allocation6] sm:$0x1] %vm49_vm0, %v112_v47  ;;  %p196_p10 = scmp.ne.s32.totalorder %s131_s20, %s195_s25  ;;  %p200_p11 = scmp.lt.s32.totalorder %s131_s20, %s131_s20 }
  0xdf   :  { %p201_p12 = scmp.lt.s32.totalorder %s199_s26, %s195_s25 }
  0xe1   :  { %p202_p13 = por %p201_p12, %p200_p11 }
  0xe3   :  { %p203_p0 = pnand %p202_p13, %p196_p10 }
  0xe5   :  { %206 = shalt.err (!%p203_p0)
}
  0xe6   :  { %133 = dma.vmem_to_hbm [thread:$0]  %s131_s20, 16, %s264_s3, [#allocation7]  }
  0xe7   :  { %217 = dma.done.wait [#allocation4], 16  }
  0xe8   :  { %218 = vsyncadd [#allocation4], 4294967280 }
  0xe9   :  { %219 = dma.done.wait [#allocation7], 16  }
  0xea   :  { %220 = vsyncadd [#allocation7], 4294967280 }
  0xeb   :  { %140 = vsyncpa [#allocation3], 1 }
  0xec   :  { %141 = vsyncpa [#allocation4], 1 }
  0xed   :  { %142 = vsyncpa [#allocation7], 1 }

</bundles_post_ra>
